<compile_context>
chip_gen: v6e
topology: v6e:2x2x1
jax: 0.10.0
libtpu: 0.0.40
codegen_flags: <defaults>
</compile_context>

<pallas_src>
import functools

import jax
import jax.numpy as jnp
from jax import lax
from jax.experimental import pallas as pl
from jax.experimental.pallas import tpu as pltpu


def _hlgc_kernel(adj_ref, norm_col_ref, norm_row_ref, x_ref, w_ref, b_ref, o_ref, *, k):
    """Fused K-hop hybrid-LGC propagation + linear projection (all VMEM resident)."""
    norm_col = norm_col_ref[...]                                    # [N, 1]  deg^-1/2
    norm_row = norm_row_ref[...]                                    # [1, N]  deg^-1/2

    # One-time (hoisted out of the K-loop): adj_half = 0.5 * D^-1/2 A D^-1/2.
    adj_half = adj_ref[...] * norm_col * norm_row * 0.5             # [N, N]

    # One-time: fold the linear weight in before propagation (the recurrence is
    # linear in the feature dimension), so the loop carries [N, F_out] and the
    # tail matmul disappears. Bias is added after the loop.
    y0 = jnp.dot(x_ref[...], w_ref[...],
                 preferred_element_type=jnp.float32)                # [N, F_out]
    y0_half = 0.5 * y0

    # Hot loop: one MXU matmul + one VPU add per hop, the only dependency chain
    # that matters at these shapes. Matmul kept in f32 (bf16 would accumulate
    # error past the 1e-4 reference tolerance over 20 hops).
    def body(_, y):
        return y0_half + jnp.dot(adj_half, y,
                                 preferred_element_type=jnp.float32)

    y = lax.fori_loop(0, k, body, y0, unroll=True)                  # K static -> fully unrolled

    o_ref[...] = (y + b_ref[...]).astype(o_ref.dtype)


def hlgc_forward(x, adj, weight, bias, *, k=20):
    """x: [N, F_in] f32, adj: [N, N] f32, weight: [F_in, F_out], bias: [1, F_out]."""
    n, f_in = x.shape
    f_out = weight.shape[1]

    # Glue: one-time degree normalization (same as the reference, computed once
    # before the K-step loop). Passed in both [N,1] and [1,N] form so the kernel
    # never has to transpose.
    deg = jnp.maximum(jnp.sum(adj, axis=0), 1.0)                    # in-degrees, clamp(min=1)
    norm_col = (deg ** -0.5).reshape(n, 1).astype(jnp.float32)
    norm_row = norm_col.reshape(1, n)

    def full(shape):
        return pl.BlockSpec(shape, lambda i, _s=shape: (0,) * len(_s))

    kernel = functools.partial(_hlgc_kernel, k=k)

    # TODO(synk): for real graphs (N >~ 2-3k) the dense [N,N] f32 adjacency blows
    # the scoped-VMEM limit (v7x's 64 MiB first); that case needs a row-tiled
    # adjacency BlockSpec with a "parallel" grid axis (megacore) and
    # vmem_limit_bytes, instead of this fully VMEM-resident grid=(1,) form.
    return pl.pallas_call(
        kernel,
        out_shape=jax.ShapeDtypeStruct((n, f_out), jnp.float32),
        grid=(1,),
        in_specs=[
            full((n, n)),          # adjacency
            full((n, 1)),          # deg^-1/2 (column form)
            full((1, n)),          # deg^-1/2 (row form)
            full((n, f_in)),       # node features
            full((f_in, f_out)),   # linear weight (already transposed)
            full((1, f_out)),      # bias
        ],
        out_specs=full((n, f_out)),
        compiler_params=pltpu.CompilerParams(
            dimension_semantics=("arbitrary",)),
    )(adj, norm_col, norm_row, x, weight, bias)


def _reference(x, adj, weight, bias, k=20):
    """Pure-JAX reference of the same forward pass (for correctness check)."""
    deg = jnp.maximum(jnp.sum(adj, axis=0), 1.0)
    norm = (deg ** -0.5)[:, None]
    x0 = x
    h = x0
    for _ in range(k):
        h = (x0 + (adj @ (h * norm)) * norm) * 0.5
    return h @ weight + bias


if __name__ == "__main__":
    N, F_IN, F_OUT, K = 32, 16, 8, 20

    key = jax.random.PRNGKey(0)
    k1, k2, k3, k4 = jax.random.split(key, 4)

    # Node features.
    x = jax.random.normal(k1, (N, F_IN), dtype=jnp.float32)

    # Deterministic synthetic undirected graph (no self loops).
    a = (jax.random.uniform(k2, (N, N)) < 0.2).astype(jnp.float32)
    adj = jnp.maximum(a, a.T) * (1.0 - jnp.eye(N, dtype=jnp.float32))

    # nn.Linear(in_features, out_features, bias=True) style init, deterministic.
    bound = 1.0 / (F_IN ** 0.5)
    weight = jax.random.uniform(k3, (F_IN, F_OUT), jnp.float32, -bound, bound)
    bias = jax.random.uniform(k4, (F_OUT,), jnp.float32, -bound, bound).reshape(1, F_OUT)

    out = hlgc_forward(x, adj, weight, bias, k=K)
    out = jax.block_until_ready(out)

    ref = _reference(x, adj, weight, bias, k=K)
    assert out.shape == (N, F_OUT)
    assert jnp.allclose(out, ref, atol=1e-4, rtol=1e-4), "mismatch vs reference"

    print("KERNEL_OK")
</pallas_src>

<mosaic_0001>
module attributes {stable_mosaic.version = 11 : i64} {
  func.func @_hlgc_kernel(%arg0: i32, %arg1: memref<32x32xf32, #tpu.memory_space<vmem>>, %arg2: memref<32x1xf32, #tpu.memory_space<vmem>>, %arg3: memref<1x32xf32, #tpu.memory_space<vmem>>, %arg4: memref<32x16xf32, #tpu.memory_space<vmem>>, %arg5: memref<16x8xf32, #tpu.memory_space<vmem>>, %arg6: memref<1x8xf32, #tpu.memory_space<vmem>>, %arg7: memref<32x8xf32, #tpu.memory_space<vmem>>) attributes {dimension_semantics = [#tpu.dimension_semantics<arbitrary>], iteration_bounds = array<i64: 1>, scalar_prefetch = 0 : i64, scratch_operands = 0 : i64, tpu.core_type = #tpu.core_type<tc>, window_params = [{pipeline_mode = #tpu.pipeline_mode<synchronous>, transform_indices = @transform_0, window_bounds = array<i64: 32, 32>}, {pipeline_mode = #tpu.pipeline_mode<synchronous>, transform_indices = @transform_1, window_bounds = array<i64: 32, 1>}, {pipeline_mode = #tpu.pipeline_mode<synchronous>, transform_indices = @transform_2, window_bounds = array<i64: 1, 32>}, {pipeline_mode = #tpu.pipeline_mode<synchronous>, transform_indices = @transform_3, window_bounds = array<i64: 32, 16>}, {pipeline_mode = #tpu.pipeline_mode<synchronous>, transform_indices = @transform_4, window_bounds = array<i64: 16, 8>}, {pipeline_mode = #tpu.pipeline_mode<synchronous>, transform_indices = @transform_5, window_bounds = array<i64: 1, 8>}, {pipeline_mode = #tpu.pipeline_mode<synchronous>, transform_indices = @transform_6, window_bounds = array<i64: 32, 8>}]} {
    %c0 = arith.constant 0 : index
    %c0_0 = arith.constant 0 : index
    %0 = vector.load %arg2[%c0, %c0_0] : memref<32x1xf32, #tpu.memory_space<vmem>>, vector<32x1xf32>
    %c0_1 = arith.constant 0 : index
    %c0_2 = arith.constant 0 : index
    %1 = vector.load %arg3[%c0_1, %c0_2] : memref<1x32xf32, #tpu.memory_space<vmem>>, vector<1x32xf32>
    %c0_3 = arith.constant 0 : index
    %c0_4 = arith.constant 0 : index
    %2 = vector.load %arg1[%c0_3, %c0_4] : memref<32x32xf32, #tpu.memory_space<vmem>>, vector<32x32xf32>
    %3 = vector.broadcast %0 : vector<32x1xf32> to vector<32x32xf32>
    %4 = arith.mulf %2, %3 : vector<32x32xf32>
    %5 = vector.broadcast %1 : vector<1x32xf32> to vector<32x32xf32>
    %6 = arith.mulf %4, %5 : vector<32x32xf32>
    %cst = arith.constant 5.000000e-01 : f32
    %7 = vector.broadcast %cst : f32 to vector<32x32xf32>
    %8 = arith.mulf %6, %7 : vector<32x32xf32>
    %c0_5 = arith.constant 0 : index
    %c0_6 = arith.constant 0 : index
    %9 = vector.load %arg4[%c0_5, %c0_6] : memref<32x16xf32, #tpu.memory_space<vmem>>, vector<32x16xf32>
    %c0_7 = arith.constant 0 : index
    %c0_8 = arith.constant 0 : index
    %10 = vector.load %arg5[%c0_7, %c0_8] : memref<16x8xf32, #tpu.memory_space<vmem>>, vector<16x8xf32>
    %cst_9 = arith.constant dense<0.000000e+00> : vector<32x8xf32>
    %11 = tpu.matmul %9, %10, %cst_9 {dimension_numbers = #tpu.dot_dimension_numbers<[1], [0], [0], [1], [0, 0, 1, 1], [], []>} : vector<32x16xf32>, vector<16x8xf32>, vector<32x8xf32> -> vector<32x8xf32>
    %cst_10 = arith.constant 5.000000e-01 : f32
    %12 = vector.broadcast %cst_10 : f32 to vector<32x8xf32>
    %13 = arith.mulf %12, %11 : vector<32x8xf32>
    %c0_i32 = arith.constant 0 : i32
    %cst_11 = arith.constant dense<0.000000e+00> : vector<32x8xf32>
    %14 = tpu.matmul %8, %11, %cst_11 {dimension_numbers = #tpu.dot_dimension_numbers<[1], [0], [0], [1], [0, 0, 1, 1], [], []>} : vector<32x32xf32>, vector<32x8xf32>, vector<32x8xf32> -> vector<32x8xf32>
    %15 = arith.addf %13, %14 : vector<32x8xf32>
    %c1_i32 = arith.constant 1 : i32
    %cst_12 = arith.constant dense<0.000000e+00> : vector<32x8xf32>
    %16 = tpu.matmul %8, %15, %cst_12 {dimension_numbers = #tpu.dot_dimension_numbers<[1], [0], [0], [1], [0, 0, 1, 1], [], []>} : vector<32x32xf32>, vector<32x8xf32>, vector<32x8xf32> -> vector<32x8xf32>
    %17 = arith.addf %13, %16 : vector<32x8xf32>
    %c2_i32 = arith.constant 2 : i32
    %cst_13 = arith.constant dense<0.000000e+00> : vector<32x8xf32>
    %18 = tpu.matmul %8, %17, %cst_13 {dimension_numbers = #tpu.dot_dimension_numbers<[1], [0], [0], [1], [0, 0, 1, 1], [], []>} : vector<32x32xf32>, vector<32x8xf32>, vector<32x8xf32> -> vector<32x8xf32>
    %19 = arith.addf %13, %18 : vector<32x8xf32>
    %c3_i32 = arith.constant 3 : i32
    %cst_14 = arith.constant dense<0.000000e+00> : vector<32x8xf32>
    %20 = tpu.matmul %8, %19, %cst_14 {dimension_numbers = #tpu.dot_dimension_numbers<[1], [0], [0], [1], [0, 0, 1, 1], [], []>} : vector<32x32xf32>, vector<32x8xf32>, vector<32x8xf32> -> vector<32x8xf32>
    %21 = arith.addf %13, %20 : vector<32x8xf32>
    %c4_i32 = arith.constant 4 : i32
    %cst_15 = arith.constant dense<0.000000e+00> : vector<32x8xf32>
    %22 = tpu.matmul %8, %21, %cst_15 {dimension_numbers = #tpu.dot_dimension_numbers<[1], [0], [0], [1], [0, 0, 1, 1], [], []>} : vector<32x32xf32>, vector<32x8xf32>, vector<32x8xf32> -> vector<32x8xf32>
    %23 = arith.addf %13, %22 : vector<32x8xf32>
    %c5_i32 = arith.constant 5 : i32
    %cst_16 = arith.constant dense<0.000000e+00> : vector<32x8xf32>
    %24 = tpu.matmul %8, %23, %cst_16 {dimension_numbers = #tpu.dot_dimension_numbers<[1], [0], [0], [1], [0, 0, 1, 1], [], []>} : vector<32x32xf32>, vector<32x8xf32>, vector<32x8xf32> -> vector<32x8xf32>
    %25 = arith.addf %13, %24 : vector<32x8xf32>
    %c6_i32 = arith.constant 6 : i32
    %cst_17 = arith.constant dense<0.000000e+00> : vector<32x8xf32>
    %26 = tpu.matmul %8, %25, %cst_17 {dimension_numbers = #tpu.dot_dimension_numbers<[1], [0], [0], [1], [0, 0, 1, 1], [], []>} : vector<32x32xf32>, vector<32x8xf32>, vector<32x8xf32> -> vector<32x8xf32>
    %27 = arith.addf %13, %26 : vector<32x8xf32>
    %c7_i32 = arith.constant 7 : i32
    %cst_18 = arith.constant dense<0.000000e+00> : vector<32x8xf32>
    %28 = tpu.matmul %8, %27, %cst_18 {dimension_numbers = #tpu.dot_dimension_numbers<[1], [0], [0], [1], [0, 0, 1, 1], [], []>} : vector<32x32xf32>, vector<32x8xf32>, vector<32x8xf32> -> vector<32x8xf32>
    %29 = arith.addf %13, %28 : vector<32x8xf32>
    %c8_i32 = arith.constant 8 : i32
    %cst_19 = arith.constant dense<0.000000e+00> : vector<32x8xf32>
    %30 = tpu.matmul %8, %29, %cst_19 {dimension_numbers = #tpu.dot_dimension_numbers<[1], [0], [0], [1], [0, 0, 1, 1], [], []>} : vector<32x32xf32>, vector<32x8xf32>, vector<32x8xf32> -> vector<32x8xf32>
    %31 = arith.addf %13, %30 : vector<32x8xf32>
    %c9_i32 = arith.constant 9 : i32
    %cst_20 = arith.constant dense<0.000000e+00> : vector<32x8xf32>
    %32 = tpu.matmul %8, %31, %cst_20 {dimension_numbers = #tpu.dot_dimension_numbers<[1], [0], [0], [1], [0, 0, 1, 1], [], []>} : vector<32x32xf32>, vector<32x8xf32>, vector<32x8xf32> -> vector<32x8xf32>
    %33 = arith.addf %13, %32 : vector<32x8xf32>
    %c10_i32 = arith.constant 10 : i32
    %cst_21 = arith.constant dense<0.000000e+00> : vector<32x8xf32>
    %34 = tpu.matmul %8, %33, %cst_21 {dimension_numbers = #tpu.dot_dimension_numbers<[1], [0], [0], [1], [0, 0, 1, 1], [], []>} : vector<32x32xf32>, vector<32x8xf32>, vector<32x8xf32> -> vector<32x8xf32>
    %35 = arith.addf %13, %34 : vector<32x8xf32>
    %c11_i32 = arith.constant 11 : i32
    %cst_22 = arith.constant dense<0.000000e+00> : vector<32x8xf32>
    %36 = tpu.matmul %8, %35, %cst_22 {dimension_numbers = #tpu.dot_dimension_numbers<[1], [0], [0], [1], [0, 0, 1, 1], [], []>} : vector<32x32xf32>, vector<32x8xf32>, vector<32x8xf32> -> vector<32x8xf32>
    %37 = arith.addf %13, %36 : vector<32x8xf32>
    %c12_i32 = arith.constant 12 : i32
    %cst_23 = arith.constant dense<0.000000e+00> : vector<32x8xf32>
    %38 = tpu.matmul %8, %37, %cst_23 {dimension_numbers = #tpu.dot_dimension_numbers<[1], [0], [0], [1], [0, 0, 1, 1], [], []>} : vector<32x32xf32>, vector<32x8xf32>, vector<32x8xf32> -> vector<32x8xf32>
    %39 = arith.addf %13, %38 : vector<32x8xf32>
    %c13_i32 = arith.constant 13 : i32
    %cst_24 = arith.constant dense<0.000000e+00> : vector<32x8xf32>
    %40 = tpu.matmul %8, %39, %cst_24 {dimension_numbers = #tpu.dot_dimension_numbers<[1], [0], [0], [1], [0, 0, 1, 1], [], []>} : vector<32x32xf32>, vector<32x8xf32>, vector<32x8xf32> -> vector<32x8xf32>
    %41 = arith.addf %13, %40 : vector<32x8xf32>
    %c14_i32 = arith.constant 14 : i32
    %cst_25 = arith.constant dense<0.000000e+00> : vector<32x8xf32>
    %42 = tpu.matmul %8, %41, %cst_25 {dimension_numbers = #tpu.dot_dimension_numbers<[1], [0], [0], [1], [0, 0, 1, 1], [], []>} : vector<32x32xf32>, vector<32x8xf32>, vector<32x8xf32> -> vector<32x8xf32>
    %43 = arith.addf %13, %42 : vector<32x8xf32>
    %c15_i32 = arith.constant 15 : i32
    %cst_26 = arith.constant dense<0.000000e+00> : vector<32x8xf32>
    %44 = tpu.matmul %8, %43, %cst_26 {dimension_numbers = #tpu.dot_dimension_numbers<[1], [0], [0], [1], [0, 0, 1, 1], [], []>} : vector<32x32xf32>, vector<32x8xf32>, vector<32x8xf32> -> vector<32x8xf32>
    %45 = arith.addf %13, %44 : vector<32x8xf32>
    %c16_i32 = arith.constant 16 : i32
    %cst_27 = arith.constant dense<0.000000e+00> : vector<32x8xf32>
    %46 = tpu.matmul %8, %45, %cst_27 {dimension_numbers = #tpu.dot_dimension_numbers<[1], [0], [0], [1], [0, 0, 1, 1], [], []>} : vector<32x32xf32>, vector<32x8xf32>, vector<32x8xf32> -> vector<32x8xf32>
    %47 = arith.addf %13, %46 : vector<32x8xf32>
    %c17_i32 = arith.constant 17 : i32
    %cst_28 = arith.constant dense<0.000000e+00> : vector<32x8xf32>
    %48 = tpu.matmul %8, %47, %cst_28 {dimension_numbers = #tpu.dot_dimension_numbers<[1], [0], [0], [1], [0, 0, 1, 1], [], []>} : vector<32x32xf32>, vector<32x8xf32>, vector<32x8xf32> -> vector<32x8xf32>
    %49 = arith.addf %13, %48 : vector<32x8xf32>
    %c18_i32 = arith.constant 18 : i32
    %cst_29 = arith.constant dense<0.000000e+00> : vector<32x8xf32>
    %50 = tpu.matmul %8, %49, %cst_29 {dimension_numbers = #tpu.dot_dimension_numbers<[1], [0], [0], [1], [0, 0, 1, 1], [], []>} : vector<32x32xf32>, vector<32x8xf32>, vector<32x8xf32> -> vector<32x8xf32>
    %51 = arith.addf %13, %50 : vector<32x8xf32>
    %c19_i32 = arith.constant 19 : i32
    %cst_30 = arith.constant dense<0.000000e+00> : vector<32x8xf32>
    %52 = tpu.matmul %8, %51, %cst_30 {dimension_numbers = #tpu.dot_dimension_numbers<[1], [0], [0], [1], [0, 0, 1, 1], [], []>} : vector<32x32xf32>, vector<32x8xf32>, vector<32x8xf32> -> vector<32x8xf32>
    %53 = arith.addf %13, %52 : vector<32x8xf32>
    %c0_31 = arith.constant 0 : index
    %c0_32 = arith.constant 0 : index
    %54 = vector.load %arg6[%c0_31, %c0_32] : memref<1x8xf32, #tpu.memory_space<vmem>>, vector<1x8xf32>
    %55 = vector.broadcast %54 : vector<1x8xf32> to vector<32x8xf32>
    %56 = arith.addf %53, %55 : vector<32x8xf32>
    %c0_33 = arith.constant 0 : index
    %c0_34 = arith.constant 0 : index
    %57 = vector.load %arg7[%c0_33, %c0_34] : memref<32x8xf32, #tpu.memory_space<vmem>>, vector<32x8xf32>
    tpu.vector_store %arg7[%c0_33, %c0_34], %56 {strides = array<i32>} : memref<32x8xf32, #tpu.memory_space<vmem>>, vector<32x8xf32>,
    return
  }
  func.func @transform_0(%arg0: i32) -> (i32, i32) {
    %c0_i32 = arith.constant 0 : i32
    %c0_i32_0 = arith.constant 0 : i32
    %c0_i32_1 = arith.constant 0 : i32
    return %c0_i32, %c0_i32_0 : i32, i32
  }
  func.func @transform_1(%arg0: i32) -> (i32, i32) {
    %c0_i32 = arith.constant 0 : i32
    %c0_i32_0 = arith.constant 0 : i32
    %c0_i32_1 = arith.constant 0 : i32
    return %c0_i32, %c0_i32_0 : i32, i32
  }
  func.func @transform_2(%arg0: i32) -> (i32, i32) {
    %c0_i32 = arith.constant 0 : i32
    %c0_i32_0 = arith.constant 0 : i32
    %c0_i32_1 = arith.constant 0 : i32
    return %c0_i32, %c0_i32_0 : i32, i32
  }
  func.func @transform_3(%arg0: i32) -> (i32, i32) {
    %c0_i32 = arith.constant 0 : i32
    %c0_i32_0 = arith.constant 0 : i32
    %c0_i32_1 = arith.constant 0 : i32
    return %c0_i32, %c0_i32_0 : i32, i32
  }
  func.func @transform_4(%arg0: i32) -> (i32, i32) {
    %c0_i32 = arith.constant 0 : i32
    %c0_i32_0 = arith.constant 0 : i32
    %c0_i32_1 = arith.constant 0 : i32
    return %c0_i32, %c0_i32_0 : i32, i32
  }
  func.func @transform_5(%arg0: i32) -> (i32, i32) {
    %c0_i32 = arith.constant 0 : i32
    %c0_i32_0 = arith.constant 0 : i32
    %c0_i32_1 = arith.constant 0 : i32
    return %c0_i32, %c0_i32_0 : i32, i32
  }
  func.func @transform_6(%arg0: i32) -> (i32, i32) {
    %c0_i32 = arith.constant 0 : i32
    %c0_i32_0 = arith.constant 0 : i32
    %c0_i32_1 = arith.constant 0 : i32
    return %c0_i32, %c0_i32_0 : i32, i32
  }
}

</mosaic_0001>

<bundles_post_ra>
// kernel: tpu_custom_call.1
= control target key start
LH: loop header
LB: loop body
LE: loop exit
PB: predicated region body
PF: predicated region fallthrough
CT: control target
= control target key end

     0   :  { %vm76_vm0 = vcmask 130048   ;;  %v2536_v3 = vmov 0   ;;  %vm178_vm1 = vcmask 261120   ;;  %vm1982_vm2 = vcmask 64512   ;;  %s2892_s4 = inlined_call_operand.vmem [shape: f32[16,8], index: 4, kind: input, shape index: {}]   ;;  %s2893_s3 = inlined_call_operand.vmem [shape: f32[32,16], index: 3, kind: input, shape index: {}]   ;;  %s2894_s1 = inlined_call_operand.vmem [shape: f32[32,1], index: 1, kind: input, shape index: {}]   ;;  %s2895_s0 = inlined_call_operand.vmem [shape: f32[32,32], index: 0, kind: input, shape index: {}]   ;;  %s2896_s2 = inlined_call_operand.vmem [shape: f32[1,32], index: 2, kind: input, shape index: {}]   ;;  %s2897_s5 = inlined_call_operand.vmem [shape: f32[1,8], index: 5, kind: input, shape index: {}]   ;;  %s2898_s6 = inlined_call_operand.vmem [shape: f32[32,8], index: 6, kind: output, shape index: {}]  }
   0x1   :  { %v75_v0 = vld [vmem:[%s2892_s4 + $0x8] sm:$0xff]  ;;  %v74_v1 = vld [vmem:[%s2892_s4] sm:$0xff]  ;;  %2534 = vset.pattern.permute.xlu0 %v2536_v3  ;;  %2535 = vset.pattern.permute.xlu1 %v2536_v3  ;;  %v25_v6 = vld [vmem:[%s2894_s1 + $0x10] sm:$0xff] }
   0x2   :  { %v70_v2 = vld [vmem:[%s2893_s3] sm:$0xff]  ;;  %2243 = vmatprep.subr.mxu0 %v75_v0  ;;  %v71_v4 = vld [vmem:[%s2893_s3 + $0x8] sm:$0xff]  ;;  %v72_v7 = vld [vmem:[%s2893_s3 + $0x10] sm:$0xff]  ;;  %44 = vperm.xlu1 %2535, %v25_v6  }
   0x3   :  { %2247 = vmatprep.mubr.msk.f32.mxu0 %vm76_vm0, %v70_v2  ;;  %2244 = vmatpush3.msra.mxu0 %v75_v0  ;;  %v23_v5 = vld [vmem:[%s2894_s1] sm:$0xff]  ;;  %v24_v8 = vld [vmem:[%s2894_s1 + $0x8] sm:$0xff]  ;;  %v26_v9 = vld [vmem:[%s2894_s1 + $0x18] sm:$0xff] }
   0x4   :  { %2245 = vmatprep.subr.mxu0 %v74_v1  ;;  %34 = vperm.xlu0 %2534, %v23_v5   ;;  %v73_v10 = vld [vmem:[%s2893_s3 + $0x18] sm:$0xff]  ;;  %v28_v11 = vld [vmem:[%s2895_s0] sm:$0xff]  ;;  %v30_v18 = vld [vmem:[%s2895_s0 + $0x10] sm:$0xff] }
   0x5   :  { %2246 = vmatpush3.msra.mxu0 %v74_v1  ;;  %v1991_v12 = vld [vmem:[%s2896_s2] ss:$0 sm:$0xff]  ;;  %v29_v21 = vld [vmem:[%s2895_s0 + $0x8] sm:$0xff]  ;;  %v31_v27 = vld [vmem:[%s2895_s0 + $0x18] sm:$0xff] }
   0x6   :  { %2248 = vmatmul.mubr.msk.f32.vlgmr.msra.gmra.mxu0 %vm76_vm0, %v71_v4  ;;  %49 = vperm.xlu1 %2535, %v26_v9  }
   0x7   :  { %2250 = vmatprep.mubr.msk.f32.mxu0 %vm76_vm0, %v72_v7 }
   0x8   :  { %39 = vperm.xlu0 %2534, %v24_v8  }
   0xa   :  { %2251 = vmatmul.mubr.msk.f32.gmra.mxu0 %vm76_vm0, %v73_v10 }
  0x7d   :  { %v45_v17 = vpop.permute.xlu1 %44 }
  0x7e   :  { %v54_v23 = vmul.f32 %v45_v17, %v30_v18 }
  0x7f   :  { %v35_v13 = vpop.permute.xlu0 %34 }
  0x80   :  { %v52_v14 = vmul.f32 %v35_v13, %v28_v11  ;;  %v64_v28 = vmul.f32 %v1991_v12, %v54_v23 }
  0x81   :  { %v50_v26 = vpop.permute.xlu1 %49 }
  0x82   :  { %v62_v15 = vmul.f32 %v1991_v12, %v52_v14  ;;  %v55_v31 = vmul.f32 %v50_v26, %v31_v27  ;;  %v2627_v32 = vmul.f32 0.5, %v64_v28 }
  0x83   :  { %v40_v20 = vpop.permute.xlu0 %39 }
  0x84   :  { %v2612_v16 = vmul.f32 0.5, %v62_v15  ;;  %v53_v24 = vmul.f32 %v40_v20, %v29_v21  ;;  %v65_v34 = vmul.f32 %v1991_v12, %v55_v31 }
  0x86   :  { %2261 = vmatprep.mubr.msk.f32.mxu1 %vm178_vm1, %v2612_v16  ;;  %2275 = vmatprep.mubr.msk.f32.mxu0 %vm178_vm1, %v2612_v16  ;;  %v63_v30 = vmul.f32 %v1991_v12, %v53_v24  ;;  %v2635_v35 = vmul.f32 0.5, %v65_v34 }
  0x88   :  { %v2629_v33 = vmul.f32 0.5, %v63_v30 }
  0xc6   :  { %v2249_v19 = vpop.f32.mrf.mxu0 }
  0xc7   :  { %v2646_v43 = vmul.f32 0.5, %v2249_v19 }
  0xc8   :  { %v155_v22 = vpop.f32.mrf.mxu0 }
  0xc9   :  { %v2649_v45 = vmul.f32 0.5, %v155_v22 }
  0xca   :  { %v2252_v25 = vpop.f32.mrf.mxu0 }
  0xcb   :  { %2253 = vmatprep.subr.mxu1 %v2252_v25  ;;  %v2641_v38 = vmul.f32 0.5, %v2252_v25 }
  0xcc   :  { %v165_v29 = vpop.f32.mrf.mxu0  ;;  %2254 = vmatpush3.msra.mxu1 %v2252_v25 }
  0xcd   :  { %2255 = vmatprep.subr.mxu1 %v165_v29  ;;  %v2643_v40 = vmul.f32 0.5, %v165_v29 }
  0xce   :  { %2256 = vmatpush3.msra.mxu1 %v165_v29 }
  0xcf   :  { %2257 = vmatprep.subr.mxu1 %v2249_v19 }
  0xd0   :  { %2258 = vmatpush3.msra.mxu1 %v2249_v19 }
  0xd1   :  { %2259 = vmatprep.subr.mxu1 %v155_v22 }
  0xd2   :  { %2260 = vmatpush3.msra.mxu1 %v155_v22 }
  0xd3   :  { %2262 = vmatmul.mubr.msk.f32.vlgmr.msra.gmra.mxu1 %vm178_vm1, %v2629_v33 }
  0xd4   :  { %2264 = vmatprep.mubr.msk.f32.mxu1 %vm178_vm1, %v2627_v32 }
  0xd7   :  { %2265 = vmatmul.mubr.msk.f32.gmra.mxu1 %vm178_vm1, %v2635_v35 }
  0xd8   :  { %2289 = vmatprep.mubr.msk.f32.mxu1 %vm178_vm1, %v2612_v16 }
 0x193   :  { %v2263_v36 = vpop.f32.mrf.mxu1 }
 0x194   :  { %v277_v46 = vadd.f32 %v2263_v36, %v2646_v43 }
 0x195   :  { %v257_v37 = vpop.f32.mrf.mxu1 }
 0x196   :  { %v276_v47 = vadd.f32 %v257_v37, %v2649_v45 }
 0x197   :  { %v2266_v39 = vpop.f32.mrf.mxu1 }
 0x198   :  { %v279_v41 = vadd.f32 %v2266_v39, %v2641_v38 }
 0x199   :  { %v267_v42 = vpop.f32.mrf.mxu1 }
 0x19a   :  { %v278_v44 = vadd.f32 %v267_v42, %v2643_v40  ;;  %2267 = vmatprep.subr.mxu0 %v279_v41 }
 0x19b   :  { %2268 = vmatpush3.msra.mxu0 %v279_v41 }
 0x19c   :  { %2269 = vmatprep.subr.mxu0 %v278_v44 }
 0x19d   :  { %2270 = vmatpush3.msra.mxu0 %v278_v44 }
 0x19e   :  { %2271 = vmatprep.subr.mxu0 %v277_v46 }
 0x19f   :  { %2272 = vmatpush3.msra.mxu0 %v277_v46 }
 0x1a0   :  { %2273 = vmatprep.subr.mxu0 %v276_v47 }
 0x1a1   :  { %2274 = vmatpush3.msra.mxu0 %v276_v47 }
 0x1a2   :  { %2276 = vmatmul.mubr.msk.f32.vlgmr.msra.gmra.mxu0 %vm178_vm1, %v2629_v33 }
 0x1a3   :  { %2278 = vmatprep.mubr.msk.f32.mxu0 %vm178_vm1, %v2627_v32 }
 0x1a6   :  { %2279 = vmatmul.mubr.msk.f32.gmra.mxu0 %vm178_vm1, %v2635_v35 }
 0x1a7   :  { %2303 = vmatprep.mubr.msk.f32.mxu0 %vm178_vm1, %v2612_v16 }
 0x262   :  { %v2277_v48 = vpop.f32.mrf.mxu0 }
 0x263   :  { %v366_v54 = vadd.f32 %v2277_v48, %v2646_v43 }
 0x264   :  { %v346_v49 = vpop.f32.mrf.mxu0 }
 0x265   :  { %v365_v55 = vadd.f32 %v346_v49, %v2649_v45 }
 0x266   :  { %v2280_v50 = vpop.f32.mrf.mxu0 }
 0x267   :  { %v368_v51 = vadd.f32 %v2280_v50, %v2641_v38 }
 0x268   :  { %v356_v52 = vpop.f32.mrf.mxu0 }
 0x269   :  { %v367_v53 = vadd.f32 %v356_v52, %v2643_v40  ;;  %2281 = vmatprep.subr.mxu1 %v368_v51 }
 0x26a   :  { %2282 = vmatpush3.msra.mxu1 %v368_v51 }
 0x26b   :  { %2283 = vmatprep.subr.mxu1 %v367_v53 }
 0x26c   :  { %2284 = vmatpush3.msra.mxu1 %v367_v53 }
 0x26d   :  { %2285 = vmatprep.subr.mxu1 %v366_v54 }
 0x26e   :  { %2286 = vmatpush3.msra.mxu1 %v366_v54 }
 0x26f   :  { %2287 = vmatprep.subr.mxu1 %v365_v55 }
 0x270   :  { %2288 = vmatpush3.msra.mxu1 %v365_v55 }
 0x271   :  { %2290 = vmatmul.mubr.msk.f32.vlgmr.msra.gmra.mxu1 %vm178_vm1, %v2629_v33 }
 0x272   :  { %2292 = vmatprep.mubr.msk.f32.mxu1 %vm178_vm1, %v2627_v32 }
 0x275   :  { %2293 = vmatmul.mubr.msk.f32.gmra.mxu1 %vm178_vm1, %v2635_v35 }
 0x276   :  { %2317 = vmatprep.mubr.msk.f32.mxu1 %vm178_vm1, %v2612_v16 }
 0x331   :  { %v2291_v56 = vpop.f32.mrf.mxu1 }
 0x332   :  { %v455_v62 = vadd.f32 %v2291_v56, %v2646_v43 }
 0x333   :  { %v435_v57 = vpop.f32.mrf.mxu1 }
 0x334   :  { %v454_v63 = vadd.f32 %v435_v57, %v2649_v45 }
 0x335   :  { %v2294_v58 = vpop.f32.mrf.mxu1 }
 0x336   :  { %v457_v59 = vadd.f32 %v2294_v58, %v2641_v38 }
 0x337   :  { %v445_v60 = vpop.f32.mrf.mxu1 }
 0x338   :  { %v456_v61 = vadd.f32 %v445_v60, %v2643_v40  ;;  %2295 = vmatprep.subr.mxu0 %v457_v59 }
 0x339   :  { %2296 = vmatpush3.msra.mxu0 %v457_v59 }
 0x33a   :  { %2297 = vmatprep.subr.mxu0 %v456_v61 }
 0x33b   :  { %2298 = vmatpush3.msra.mxu0 %v456_v61 }
 0x33c   :  { %2299 = vmatprep.subr.mxu0 %v455_v62 }
 0x33d   :  { %2300 = vmatpush3.msra.mxu0 %v455_v62 }
 0x33e   :  { %2301 = vmatprep.subr.mxu0 %v454_v63 }
 0x33f   :  { %2302 = vmatpush3.msra.mxu0 %v454_v63 }
 0x340   :  { %2304 = vmatmul.mubr.msk.f32.vlgmr.msra.gmra.mxu0 %vm178_vm1, %v2629_v33 }
 0x341   :  { %2306 = vmatprep.mubr.msk.f32.mxu0 %vm178_vm1, %v2627_v32 }
 0x344   :  { %2307 = vmatmul.mubr.msk.f32.gmra.mxu0 %vm178_vm1, %v2635_v35 }
 0x345   :  { %2331 = vmatprep.mubr.msk.f32.mxu0 %vm178_vm1, %v2612_v16 }
 0x400   :  { %v2305_v0 = vpop.f32.mrf.mxu0 }
 0x401   :  { %v544_v6 = vadd.f32 %v2305_v0, %v2646_v43 }
 0x402   :  { %v524_v1 = vpop.f32.mrf.mxu0 }
 0x403   :  { %v543_v7 = vadd.f32 %v524_v1, %v2649_v45 }
 0x404   :  { %v2308_v2 = vpop.f32.mrf.mxu0 }
 0x405   :  { %v546_v3 = vadd.f32 %v2308_v2, %v2641_v38 }
 0x406   :  { %v534_v4 = vpop.f32.mrf.mxu0 }
 0x407   :  { %v545_v5 = vadd.f32 %v534_v4, %v2643_v40  ;;  %2309 = vmatprep.subr.mxu1 %v546_v3 }
 0x408   :  { %2310 = vmatpush3.msra.mxu1 %v546_v3 }
 0x409   :  { %2311 = vmatprep.subr.mxu1 %v545_v5 }
 0x40a   :  { %2312 = vmatpush3.msra.mxu1 %v545_v5 }
 0x40b   :  { %2313 = vmatprep.subr.mxu1 %v544_v6 }
 0x40c   :  { %2314 = vmatpush3.msra.mxu1 %v544_v6 }
 0x40d   :  { %2315 = vmatprep.subr.mxu1 %v543_v7 }
 0x40e   :  { %2316 = vmatpush3.msra.mxu1 %v543_v7 }
 0x40f   :  { %2318 = vmatmul.mubr.msk.f32.vlgmr.msra.gmra.mxu1 %vm178_vm1, %v2629_v33 }
 0x410   :  { %2320 = vmatprep.mubr.msk.f32.mxu1 %vm178_vm1, %v2627_v32 }
 0x413   :  { %2321 = vmatmul.mubr.msk.f32.gmra.mxu1 %vm178_vm1, %v2635_v35 }
 0x414   :  { %2345 = vmatprep.mubr.msk.f32.mxu1 %vm178_vm1, %v2612_v16 }
 0x4cf   :  { %v2319_v8 = vpop.f32.mrf.mxu1 }
 0x4d0   :  { %v633_v14 = vadd.f32 %v2319_v8, %v2646_v43 }
 0x4d1   :  { %v613_v9 = vpop.f32.mrf.mxu1 }
 0x4d2   :  { %v632_v15 = vadd.f32 %v613_v9, %v2649_v45 }
 0x4d3   :  { %v2322_v10 = vpop.f32.mrf.mxu1 }
 0x4d4   :  { %v635_v11 = vadd.f32 %v2322_v10, %v2641_v38 }
 0x4d5   :  { %v623_v12 = vpop.f32.mrf.mxu1 }
 0x4d6   :  { %v634_v13 = vadd.f32 %v623_v12, %v2643_v40  ;;  %2323 = vmatprep.subr.mxu0 %v635_v11 }
 0x4d7   :  { %2324 = vmatpush3.msra.mxu0 %v635_v11 }
 0x4d8   :  { %2325 = vmatprep.subr.mxu0 %v634_v13 }
 0x4d9   :  { %2326 = vmatpush3.msra.mxu0 %v634_v13 }
 0x4da   :  { %2327 = vmatprep.subr.mxu0 %v633_v14 }
 0x4db   :  { %2328 = vmatpush3.msra.mxu0 %v633_v14 }
 0x4dc   :  { %2329 = vmatprep.subr.mxu0 %v632_v15 }
 0x4dd   :  { %2330 = vmatpush3.msra.mxu0 %v632_v15 }
 0x4de   :  { %2332 = vmatmul.mubr.msk.f32.vlgmr.msra.gmra.mxu0 %vm178_vm1, %v2629_v33 }
 0x4df   :  { %2334 = vmatprep.mubr.msk.f32.mxu0 %vm178_vm1, %v2627_v32 }
 0x4e2   :  { %2335 = vmatmul.mubr.msk.f32.gmra.mxu0 %vm178_vm1, %v2635_v35 }
 0x4e3   :  { %2359 = vmatprep.mubr.msk.f32.mxu0 %vm178_vm1, %v2612_v16 }
 0x59e   :  { %v2333_v17 = vpop.f32.mrf.mxu0 }
 0x59f   :  { %v722_v23 = vadd.f32 %v2333_v17, %v2646_v43 }
 0x5a0   :  { %v702_v18 = vpop.f32.mrf.mxu0 }
 0x5a1   :  { %v721_v24 = vadd.f32 %v702_v18, %v2649_v45 }
 0x5a2   :  { %v2336_v19 = vpop.f32.mrf.mxu0 }
 0x5a3   :  { %v724_v20 = vadd.f32 %v2336_v19, %v2641_v38 }
 0x5a4   :  { %v712_v21 = vpop.f32.mrf.mxu0 }
 0x5a5   :  { %v723_v22 = vadd.f32 %v712_v21, %v2643_v40  ;;  %2337 = vmatprep.subr.mxu1 %v724_v20 }
 0x5a6   :  { %2338 = vmatpush3.msra.mxu1 %v724_v20 }
 0x5a7   :  { %2339 = vmatprep.subr.mxu1 %v723_v22 }
 0x5a8   :  { %2340 = vmatpush3.msra.mxu1 %v723_v22 }
 0x5a9   :  { %2341 = vmatprep.subr.mxu1 %v722_v23 }
 0x5aa   :  { %2342 = vmatpush3.msra.mxu1 %v722_v23 }
 0x5ab   :  { %2343 = vmatprep.subr.mxu1 %v721_v24 }
 0x5ac   :  { %2344 = vmatpush3.msra.mxu1 %v721_v24 }
 0x5ad   :  { %2346 = vmatmul.mubr.msk.f32.vlgmr.msra.gmra.mxu1 %vm178_vm1, %v2629_v33 }
 0x5ae   :  { %2348 = vmatprep.mubr.msk.f32.mxu1 %vm178_vm1, %v2627_v32 }
 0x5b1   :  { %2349 = vmatmul.mubr.msk.f32.gmra.mxu1 %vm178_vm1, %v2635_v35 }
 0x5b2   :  { %2373 = vmatprep.mubr.msk.f32.mxu1 %vm178_vm1, %v2612_v16 }
 0x66d   :  { %v2347_v25 = vpop.f32.mrf.mxu1 }
 0x66e   :  { %v811_v31 = vadd.f32 %v2347_v25, %v2646_v43 }
 0x66f   :  { %v791_v26 = vpop.f32.mrf.mxu1 }
 0x670   :  { %v810_v34 = vadd.f32 %v791_v26, %v2649_v45 }
 0x671   :  { %v2350_v27 = vpop.f32.mrf.mxu1 }
 0x672   :  { %v813_v28 = vadd.f32 %v2350_v27, %v2641_v38 }
 0x673   :  { %v801_v29 = vpop.f32.mrf.mxu1 }
 0x674   :  { %v812_v30 = vadd.f32 %v801_v29, %v2643_v40  ;;  %2351 = vmatprep.subr.mxu0 %v813_v28 }
 0x675   :  { %2352 = vmatpush3.msra.mxu0 %v813_v28 }
 0x676   :  { %2353 = vmatprep.subr.mxu0 %v812_v30 }
 0x677   :  { %2354 = vmatpush3.msra.mxu0 %v812_v30 }
 0x678   :  { %2355 = vmatprep.subr.mxu0 %v811_v31 }
 0x679   :  { %2356 = vmatpush3.msra.mxu0 %v811_v31 }
 0x67a   :  { %2357 = vmatprep.subr.mxu0 %v810_v34 }
 0x67b   :  { %2358 = vmatpush3.msra.mxu0 %v810_v34 }
 0x67c   :  { %2360 = vmatmul.mubr.msk.f32.vlgmr.msra.gmra.mxu0 %vm178_vm1, %v2629_v33 }
 0x67d   :  { %2362 = vmatprep.mubr.msk.f32.mxu0 %vm178_vm1, %v2627_v32 }
 0x680   :  { %2363 = vmatmul.mubr.msk.f32.gmra.mxu0 %vm178_vm1, %v2635_v35 }
 0x681   :  { %2387 = vmatprep.mubr.msk.f32.mxu0 %vm178_vm1, %v2612_v16 }
 0x73c   :  { %v2361_v36 = vpop.f32.mrf.mxu0 }
 0x73d   :  { %v900_v46 = vadd.f32 %v2361_v36, %v2646_v43 }
 0x73e   :  { %v880_v37 = vpop.f32.mrf.mxu0 }
 0x73f   :  { %v899_v47 = vadd.f32 %v880_v37, %v2649_v45 }
 0x740   :  { %v2364_v39 = vpop.f32.mrf.mxu0 }
 0x741   :  { %v902_v41 = vadd.f32 %v2364_v39, %v2641_v38 }
 0x742   :  { %v890_v42 = vpop.f32.mrf.mxu0 }
 0x743   :  { %v901_v44 = vadd.f32 %v890_v42, %v2643_v40  ;;  %2365 = vmatprep.subr.mxu1 %v902_v41 }
 0x744   :  { %2366 = vmatpush3.msra.mxu1 %v902_v41 }
 0x745   :  { %2367 = vmatprep.subr.mxu1 %v901_v44 }
 0x746   :  { %2368 = vmatpush3.msra.mxu1 %v901_v44 }
 0x747   :  { %2369 = vmatprep.subr.mxu1 %v900_v46 }
 0x748   :  { %2370 = vmatpush3.msra.mxu1 %v900_v46 }
 0x749   :  { %2371 = vmatprep.subr.mxu1 %v899_v47 }
 0x74a   :  { %2372 = vmatpush3.msra.mxu1 %v899_v47 }
 0x74b   :  { %2374 = vmatmul.mubr.msk.f32.vlgmr.msra.gmra.mxu1 %vm178_vm1, %v2629_v33 }
 0x74c   :  { %2376 = vmatprep.mubr.msk.f32.mxu1 %vm178_vm1, %v2627_v32 }
 0x74f   :  { %2377 = vmatmul.mubr.msk.f32.gmra.mxu1 %vm178_vm1, %v2635_v35 }
 0x750   :  { %2401 = vmatprep.mubr.msk.f32.mxu1 %vm178_vm1, %v2612_v16 }
 0x80b   :  { %v2375_v48 = vpop.f32.mrf.mxu1 }
 0x80c   :  { %v989_v54 = vadd.f32 %v2375_v48, %v2646_v43 }
 0x80d   :  { %v969_v49 = vpop.f32.mrf.mxu1 }
 0x80e   :  { %v988_v55 = vadd.f32 %v969_v49, %v2649_v45 }
 0x80f   :  { %v2378_v50 = vpop.f32.mrf.mxu1 }
 0x810   :  { %v991_v51 = vadd.f32 %v2378_v50, %v2641_v38 }
 0x811   :  { %v979_v52 = vpop.f32.mrf.mxu1 }
 0x812   :  { %v990_v53 = vadd.f32 %v979_v52, %v2643_v40  ;;  %2379 = vmatprep.subr.mxu0 %v991_v51 }
 0x813   :  { %2380 = vmatpush3.msra.mxu0 %v991_v51 }
 0x814   :  { %2381 = vmatprep.subr.mxu0 %v990_v53 }
 0x815   :  { %2382 = vmatpush3.msra.mxu0 %v990_v53 }
 0x816   :  { %2383 = vmatprep.subr.mxu0 %v989_v54 }
 0x817   :  { %2384 = vmatpush3.msra.mxu0 %v989_v54 }
 0x818   :  { %2385 = vmatprep.subr.mxu0 %v988_v55 }
 0x819   :  { %2386 = vmatpush3.msra.mxu0 %v988_v55 }
 0x81a   :  { %2388 = vmatmul.mubr.msk.f32.vlgmr.msra.gmra.mxu0 %vm178_vm1, %v2629_v33 }
 0x81b   :  { %2390 = vmatprep.mubr.msk.f32.mxu0 %vm178_vm1, %v2627_v32 }
 0x81e   :  { %2391 = vmatmul.mubr.msk.f32.gmra.mxu0 %vm178_vm1, %v2635_v35 }
 0x81f   :  { %2415 = vmatprep.mubr.msk.f32.mxu0 %vm178_vm1, %v2612_v16 }
 0x8da   :  { %v2389_v56 = vpop.f32.mrf.mxu0 }
 0x8db   :  { %v1078_v62 = vadd.f32 %v2389_v56, %v2646_v43 }
 0x8dc   :  { %v1058_v57 = vpop.f32.mrf.mxu0 }
 0x8dd   :  { %v1077_v63 = vadd.f32 %v1058_v57, %v2649_v45 }
 0x8de   :  { %v2392_v58 = vpop.f32.mrf.mxu0 }
 0x8df   :  { %v1080_v59 = vadd.f32 %v2392_v58, %v2641_v38 }
 0x8e0   :  { %v1068_v60 = vpop.f32.mrf.mxu0 }
 0x8e1   :  { %v1079_v61 = vadd.f32 %v1068_v60, %v2643_v40  ;;  %2393 = vmatprep.subr.mxu1 %v1080_v59 }
 0x8e2   :  { %2394 = vmatpush3.msra.mxu1 %v1080_v59 }
 0x8e3   :  { %2395 = vmatprep.subr.mxu1 %v1079_v61 }
 0x8e4   :  { %2396 = vmatpush3.msra.mxu1 %v1079_v61 }
 0x8e5   :  { %2397 = vmatprep.subr.mxu1 %v1078_v62 }
 0x8e6   :  { %2398 = vmatpush3.msra.mxu1 %v1078_v62 }
 0x8e7   :  { %2399 = vmatprep.subr.mxu1 %v1077_v63 }
 0x8e8   :  { %2400 = vmatpush3.msra.mxu1 %v1077_v63 }
 0x8e9   :  { %2402 = vmatmul.mubr.msk.f32.vlgmr.msra.gmra.mxu1 %vm178_vm1, %v2629_v33 }
 0x8ea   :  { %2404 = vmatprep.mubr.msk.f32.mxu1 %vm178_vm1, %v2627_v32 }
 0x8ed   :  { %2405 = vmatmul.mubr.msk.f32.gmra.mxu1 %vm178_vm1, %v2635_v35 }
 0x8ee   :  { %2429 = vmatprep.mubr.msk.f32.mxu1 %vm178_vm1, %v2612_v16 }
 0x9a9   :  { %v2403_v0 = vpop.f32.mrf.mxu1 }
 0x9aa   :  { %v1167_v6 = vadd.f32 %v2403_v0, %v2646_v43 }
 0x9ab   :  { %v1147_v1 = vpop.f32.mrf.mxu1 }
 0x9ac   :  { %v1166_v7 = vadd.f32 %v1147_v1, %v2649_v45 }
 0x9ad   :  { %v2406_v2 = vpop.f32.mrf.mxu1 }
 0x9ae   :  { %v1169_v3 = vadd.f32 %v2406_v2, %v2641_v38 }
 0x9af   :  { %v1157_v4 = vpop.f32.mrf.mxu1 }
 0x9b0   :  { %v1168_v5 = vadd.f32 %v1157_v4, %v2643_v40  ;;  %2407 = vmatprep.subr.mxu0 %v1169_v3 }
 0x9b1   :  { %2408 = vmatpush3.msra.mxu0 %v1169_v3 }
 0x9b2   :  { %2409 = vmatprep.subr.mxu0 %v1168_v5 }
 0x9b3   :  { %2410 = vmatpush3.msra.mxu0 %v1168_v5 }
 0x9b4   :  { %2411 = vmatprep.subr.mxu0 %v1167_v6 }
 0x9b5   :  { %2412 = vmatpush3.msra.mxu0 %v1167_v6 }
 0x9b6   :  { %2413 = vmatprep.subr.mxu0 %v1166_v7 }
 0x9b7   :  { %2414 = vmatpush3.msra.mxu0 %v1166_v7 }
 0x9b8   :  { %2416 = vmatmul.mubr.msk.f32.vlgmr.msra.gmra.mxu0 %vm178_vm1, %v2629_v33 }
 0x9b9   :  { %2418 = vmatprep.mubr.msk.f32.mxu0 %vm178_vm1, %v2627_v32 }
 0x9bc   :  { %2419 = vmatmul.mubr.msk.f32.gmra.mxu0 %vm178_vm1, %v2635_v35 }
 0x9bd   :  { %2443 = vmatprep.mubr.msk.f32.mxu0 %vm178_vm1, %v2612_v16 }
 0xa78   :  { %v2417_v8 = vpop.f32.mrf.mxu0 }
 0xa79   :  { %v1256_v14 = vadd.f32 %v2417_v8, %v2646_v43 }
 0xa7a   :  { %v1236_v9 = vpop.f32.mrf.mxu0 }
 0xa7b   :  { %v1255_v15 = vadd.f32 %v1236_v9, %v2649_v45 }
 0xa7c   :  { %v2420_v10 = vpop.f32.mrf.mxu0 }
 0xa7d   :  { %v1258_v11 = vadd.f32 %v2420_v10, %v2641_v38 }
 0xa7e   :  { %v1246_v12 = vpop.f32.mrf.mxu0 }
 0xa7f   :  { %v1257_v13 = vadd.f32 %v1246_v12, %v2643_v40  ;;  %2421 = vmatprep.subr.mxu1 %v1258_v11 }
 0xa80   :  { %2422 = vmatpush3.msra.mxu1 %v1258_v11 }
 0xa81   :  { %2423 = vmatprep.subr.mxu1 %v1257_v13 }
 0xa82   :  { %2424 = vmatpush3.msra.mxu1 %v1257_v13 }
 0xa83   :  { %2425 = vmatprep.subr.mxu1 %v1256_v14 }
 0xa84   :  { %2426 = vmatpush3.msra.mxu1 %v1256_v14 }
 0xa85   :  { %2427 = vmatprep.subr.mxu1 %v1255_v15 }
 0xa86   :  { %2428 = vmatpush3.msra.mxu1 %v1255_v15 }
 0xa87   :  { %2430 = vmatmul.mubr.msk.f32.vlgmr.msra.gmra.mxu1 %vm178_vm1, %v2629_v33 }
 0xa88   :  { %2432 = vmatprep.mubr.msk.f32.mxu1 %vm178_vm1, %v2627_v32 }
 0xa8b   :  { %2433 = vmatmul.mubr.msk.f32.gmra.mxu1 %vm178_vm1, %v2635_v35 }
 0xa8c   :  { %2457 = vmatprep.mubr.msk.f32.mxu1 %vm178_vm1, %v2612_v16 }
 0xb47   :  { %v2431_v17 = vpop.f32.mrf.mxu1 }
 0xb48   :  { %v1345_v23 = vadd.f32 %v2431_v17, %v2646_v43  ;;  %v2076_v17 = vld [vmem:[%s2897_s5] ss:$0 sm:$0xff] }
 0xb49   :  { %v1325_v18 = vpop.f32.mrf.mxu1 }
 0xb4a   :  { %v1344_v24 = vadd.f32 %v1325_v18, %v2649_v45 }
 0xb4b   :  { %v2434_v19 = vpop.f32.mrf.mxu1 }
 0xb4c   :  { %v1347_v20 = vadd.f32 %v2434_v19, %v2641_v38 }
 0xb4d   :  { %v1335_v21 = vpop.f32.mrf.mxu1 }
 0xb4e   :  { %v1346_v22 = vadd.f32 %v1335_v21, %v2643_v40  ;;  %2435 = vmatprep.subr.mxu0 %v1347_v20 }
 0xb4f   :  { %2436 = vmatpush3.msra.mxu0 %v1347_v20 }
 0xb50   :  { %2437 = vmatprep.subr.mxu0 %v1346_v22 }
 0xb51   :  { %2438 = vmatpush3.msra.mxu0 %v1346_v22 }
 0xb52   :  { %2439 = vmatprep.subr.mxu0 %v1345_v23 }
 0xb53   :  { %2440 = vmatpush3.msra.mxu0 %v1345_v23 }
 0xb54   :  { %2441 = vmatprep.subr.mxu0 %v1344_v24 }
 0xb55   :  { %2442 = vmatpush3.msra.mxu0 %v1344_v24 }
 0xb56   :  { %2444 = vmatmul.mubr.msk.f32.vlgmr.msra.gmra.mxu0 %vm178_vm1, %v2629_v33 }
 0xb57   :  { %2446 = vmatprep.mubr.msk.f32.mxu0 %vm178_vm1, %v2627_v32 }
 0xb5a   :  { %2447 = vmatmul.mubr.msk.f32.gmra.mxu0 %vm178_vm1, %v2635_v35 }
 0xb5b   :  { %2471 = vmatprep.mubr.msk.f32.mxu0 %vm178_vm1, %v2612_v16 }
 0xc16   :  { %v2445_v25 = vpop.f32.mrf.mxu0 }
 0xc17   :  { %v1434_v31 = vadd.f32 %v2445_v25, %v2646_v43 }
 0xc18   :  { %v1414_v26 = vpop.f32.mrf.mxu0 }
 0xc19   :  { %v1433_v34 = vadd.f32 %v1414_v26, %v2649_v45 }
 0xc1a   :  { %v2448_v27 = vpop.f32.mrf.mxu0 }
 0xc1b   :  { %v1436_v28 = vadd.f32 %v2448_v27, %v2641_v38 }
 0xc1c   :  { %v1424_v29 = vpop.f32.mrf.mxu0 }
 0xc1d   :  { %v1435_v30 = vadd.f32 %v1424_v29, %v2643_v40  ;;  %2449 = vmatprep.subr.mxu1 %v1436_v28 }
 0xc1e   :  { %2450 = vmatpush3.msra.mxu1 %v1436_v28 }
 0xc1f   :  { %2451 = vmatprep.subr.mxu1 %v1435_v30 }
 0xc20   :  { %2452 = vmatpush3.msra.mxu1 %v1435_v30 }
 0xc21   :  { %2453 = vmatprep.subr.mxu1 %v1434_v31 }
 0xc22   :  { %2454 = vmatpush3.msra.mxu1 %v1434_v31 }
 0xc23   :  { %2455 = vmatprep.subr.mxu1 %v1433_v34 }
 0xc24   :  { %2456 = vmatpush3.msra.mxu1 %v1433_v34 }
 0xc25   :  { %2458 = vmatmul.mubr.msk.f32.vlgmr.msra.gmra.mxu1 %vm178_vm1, %v2629_v33 }
 0xc26   :  { %2460 = vmatprep.mubr.msk.f32.mxu1 %vm178_vm1, %v2627_v32 }
 0xc29   :  { %2461 = vmatmul.mubr.msk.f32.gmra.mxu1 %vm178_vm1, %v2635_v35 }
 0xc2a   :  { %2485 = vmatprep.mubr.msk.f32.mxu1 %vm178_vm1, %v2612_v16 }
 0xce5   :  { %v2459_v36 = vpop.f32.mrf.mxu1 }
 0xce6   :  { %v1523_v46 = vadd.f32 %v2459_v36, %v2646_v43 }
 0xce7   :  { %v1503_v37 = vpop.f32.mrf.mxu1 }
 0xce8   :  { %v1522_v47 = vadd.f32 %v1503_v37, %v2649_v45 }
 0xce9   :  { %v2462_v39 = vpop.f32.mrf.mxu1 }
 0xcea   :  { %v1525_v41 = vadd.f32 %v2462_v39, %v2641_v38 }
 0xceb   :  { %v1513_v42 = vpop.f32.mrf.mxu1 }
 0xcec   :  { %v1524_v44 = vadd.f32 %v1513_v42, %v2643_v40  ;;  %2463 = vmatprep.subr.mxu0 %v1525_v41 }
 0xced   :  { %2464 = vmatpush3.msra.mxu0 %v1525_v41 }
 0xcee   :  { %2465 = vmatprep.subr.mxu0 %v1524_v44 }
 0xcef   :  { %2466 = vmatpush3.msra.mxu0 %v1524_v44 }
 0xcf0   :  { %2467 = vmatprep.subr.mxu0 %v1523_v46 }
 0xcf1   :  { %2468 = vmatpush3.msra.mxu0 %v1523_v46 }
 0xcf2   :  { %2469 = vmatprep.subr.mxu0 %v1522_v47 }
 0xcf3   :  { %2470 = vmatpush3.msra.mxu0 %v1522_v47 }
 0xcf4   :  { %2472 = vmatmul.mubr.msk.f32.vlgmr.msra.gmra.mxu0 %vm178_vm1, %v2629_v33 }
 0xcf5   :  { %2474 = vmatprep.mubr.msk.f32.mxu0 %vm178_vm1, %v2627_v32 }
 0xcf8   :  { %2475 = vmatmul.mubr.msk.f32.gmra.mxu0 %vm178_vm1, %v2635_v35 }
 0xcf9   :  { %2499 = vmatprep.mubr.msk.f32.mxu0 %vm178_vm1, %v2612_v16 }
 0xdb4   :  { %v2473_v48 = vpop.f32.mrf.mxu0 }
 0xdb5   :  { %v1612_v54 = vadd.f32 %v2473_v48, %v2646_v43 }
 0xdb6   :  { %v1592_v49 = vpop.f32.mrf.mxu0 }
 0xdb7   :  { %v1611_v55 = vadd.f32 %v1592_v49, %v2649_v45 }
 0xdb8   :  { %v2476_v50 = vpop.f32.mrf.mxu0 }
 0xdb9   :  { %v1614_v51 = vadd.f32 %v2476_v50, %v2641_v38 }
 0xdba   :  { %v1602_v52 = vpop.f32.mrf.mxu0 }
 0xdbb   :  { %v1613_v53 = vadd.f32 %v1602_v52, %v2643_v40  ;;  %2477 = vmatprep.subr.mxu1 %v1614_v51 }
 0xdbc   :  { %2478 = vmatpush3.msra.mxu1 %v1614_v51 }
 0xdbd   :  { %2479 = vmatprep.subr.mxu1 %v1613_v53 }
 0xdbe   :  { %2480 = vmatpush3.msra.mxu1 %v1613_v53 }
 0xdbf   :  { %2481 = vmatprep.subr.mxu1 %v1612_v54 }
 0xdc0   :  { %2482 = vmatpush3.msra.mxu1 %v1612_v54 }
 0xdc1   :  { %2483 = vmatprep.subr.mxu1 %v1611_v55 }
 0xdc2   :  { %2484 = vmatpush3.msra.mxu1 %v1611_v55 }
 0xdc3   :  { %2486 = vmatmul.mubr.msk.f32.vlgmr.msra.gmra.mxu1 %vm178_vm1, %v2629_v33 }
 0xdc4   :  { %2488 = vmatprep.mubr.msk.f32.mxu1 %vm178_vm1, %v2627_v32 }
 0xdc7   :  { %2489 = vmatmul.mubr.msk.f32.gmra.mxu1 %vm178_vm1, %v2635_v35 }
 0xdc8   :  { %2513 = vmatprep.mubr.msk.f32.mxu1 %vm178_vm1, %v2612_v16 }
 0xe83   :  { %v2487_v56 = vpop.f32.mrf.mxu1 }
 0xe84   :  { %v1701_v62 = vadd.f32 %v2487_v56, %v2646_v43 }
 0xe85   :  { %v1681_v57 = vpop.f32.mrf.mxu1 }
 0xe86   :  { %v1700_v63 = vadd.f32 %v1681_v57, %v2649_v45 }
 0xe87   :  { %v2490_v58 = vpop.f32.mrf.mxu1 }
 0xe88   :  { %v1703_v59 = vadd.f32 %v2490_v58, %v2641_v38 }
 0xe89   :  { %v1691_v60 = vpop.f32.mrf.mxu1 }
 0xe8a   :  { %v1702_v61 = vadd.f32 %v1691_v60, %v2643_v40  ;;  %2491 = vmatprep.subr.mxu0 %v1703_v59 }
 0xe8b   :  { %2492 = vmatpush3.msra.mxu0 %v1703_v59 }
 0xe8c   :  { %2493 = vmatprep.subr.mxu0 %v1702_v61 }
 0xe8d   :  { %2494 = vmatpush3.msra.mxu0 %v1702_v61 }
 0xe8e   :  { %2495 = vmatprep.subr.mxu0 %v1701_v62 }
 0xe8f   :  { %2496 = vmatpush3.msra.mxu0 %v1701_v62 }
 0xe90   :  { %2497 = vmatprep.subr.mxu0 %v1700_v63 }
 0xe91   :  { %2498 = vmatpush3.msra.mxu0 %v1700_v63 }
 0xe92   :  { %2500 = vmatmul.mubr.msk.f32.vlgmr.msra.gmra.mxu0 %vm178_vm1, %v2629_v33 }
 0xe93   :  { %2502 = vmatprep.mubr.msk.f32.mxu0 %vm178_vm1, %v2627_v32 }
 0xe96   :  { %2503 = vmatmul.mubr.msk.f32.gmra.mxu0 %vm178_vm1, %v2635_v35 }
 0xe97   :  { %2527 = vmatprep.mubr.msk.f32.mxu0 %vm178_vm1, %v2612_v16 }
 0xf52   :  { %v2501_v0 = vpop.f32.mrf.mxu0 }
 0xf53   :  { %v1790_v6 = vadd.f32 %v2501_v0, %v2646_v43 }
 0xf54   :  { %v1770_v1 = vpop.f32.mrf.mxu0 }
 0xf55   :  { %v1789_v7 = vadd.f32 %v1770_v1, %v2649_v45 }
 0xf56   :  { %v2504_v2 = vpop.f32.mrf.mxu0 }
 0xf57   :  { %v1792_v3 = vadd.f32 %v2504_v2, %v2641_v38 }
 0xf58   :  { %v1780_v4 = vpop.f32.mrf.mxu0 }
 0xf59   :  { %v1791_v5 = vadd.f32 %v1780_v4, %v2643_v40  ;;  %2505 = vmatprep.subr.mxu1 %v1792_v3 }
 0xf5a   :  { %2506 = vmatpush3.msra.mxu1 %v1792_v3 }
 0xf5b   :  { %2507 = vmatprep.subr.mxu1 %v1791_v5 }
 0xf5c   :  { %2508 = vmatpush3.msra.mxu1 %v1791_v5 }
 0xf5d   :  { %2509 = vmatprep.subr.mxu1 %v1790_v6 }
 0xf5e   :  { %2510 = vmatpush3.msra.mxu1 %v1790_v6 }
 0xf5f   :  { %2511 = vmatprep.subr.mxu1 %v1789_v7 }
 0xf60   :  { %2512 = vmatpush3.msra.mxu1 %v1789_v7 }
 0xf61   :  { %2514 = vmatmul.mubr.msk.f32.vlgmr.msra.gmra.mxu1 %vm178_vm1, %v2629_v33 }
 0xf62   :  { %2516 = vmatprep.mubr.msk.f32.mxu1 %vm178_vm1, %v2627_v32 }
 0xf65   :  { %2517 = vmatmul.mubr.msk.f32.gmra.mxu1 %vm178_vm1, %v2635_v35 }
0x1021   :  { %v2515_v16 = vpop.f32.mrf.mxu1 }
0x1022   :  { %v1879_v13 = vadd.f32 %v2515_v16, %v2646_v43 }
0x1023   :  { %v1859_v8 = vpop.f32.mrf.mxu1 }
0x1024   :  { %v1878_v14 = vadd.f32 %v1859_v8, %v2649_v45 }
0x1025   :  { %v2518_v9 = vpop.f32.mrf.mxu1 }
0x1026   :  { %v1881_v10 = vadd.f32 %v2518_v9, %v2641_v38 }
0x1027   :  { %v1869_v11 = vpop.f32.mrf.mxu1 }
0x1028   :  { %v1880_v12 = vadd.f32 %v1869_v11, %v2643_v40  ;;  %2519 = vmatprep.subr.mxu0 %v1881_v10 }
0x1029   :  { %2520 = vmatpush3.msra.mxu0 %v1881_v10 }
0x102a   :  { %2521 = vmatprep.subr.mxu0 %v1880_v12 }
0x102b   :  { %2522 = vmatpush3.msra.mxu0 %v1880_v12 }
0x102c   :  { %2523 = vmatprep.subr.mxu0 %v1879_v13 }
0x102d   :  { %2524 = vmatpush3.msra.mxu0 %v1879_v13 }
0x102e   :  { %2525 = vmatprep.subr.mxu0 %v1878_v14 }
0x102f   :  { %2526 = vmatpush3.msra.mxu0 %v1878_v14 }
0x1030   :  { %2528 = vmatmul.mubr.msk.f32.vlgmr.msra.gmra.mxu0 %vm178_vm1, %v2629_v33 }
0x1031   :  { %2530 = vmatprep.mubr.msk.f32.mxu0 %vm178_vm1, %v2627_v32 }
0x1034   :  { %2531 = vmatmul.mubr.msk.f32.gmra.mxu0 %vm178_vm1, %v2635_v35 }
0x10f0   :  { %v2529_v15 = vpop.f32.mrf.mxu0 }
0x10f1   :  { %v1968_v18 = vadd.f32 %v2529_v15, %v2646_v43 }
0x10f2   :  { %v1948_v19 = vpop.f32.mrf.mxu0 }
0x10f3   :  { %v1979_v20 = vadd.f32 %v2076_v17, %v1968_v18  ;;  %v1967_v21 = vadd.f32 %v1948_v19, %v2649_v45 }
0x10f4   :  { %v2532_v22 = vpop.f32.mrf.mxu0 }
0x10f5   :  { %1984 = vst.msk [vmem:[%s2898_s6 + $0x8] sm:$0xff] %vm1982_vm2, %v1979_v20  ;;  %v1978_v32 = vadd.f32 %v2076_v17, %v1967_v21  ;;  %v1970_v33 = vadd.f32 %v2532_v22, %v2641_v38 }
0x10f6   :  { %v1958_v35 = vpop.f32.mrf.mxu0 }
0x10f7   :  { %1983 = vst.msk [vmem:[%s2898_s6] sm:$0xff] %vm1982_vm2, %v1978_v32  ;;  %v1981_v23 = vadd.f32 %v2076_v17, %v1970_v33  ;;  %v1969_v43 = vadd.f32 %v1958_v35, %v2643_v40 }
0x10f9   :  { %1986 = vst.msk [vmem:[%s2898_s6 + $0x18] sm:$0xff] %vm1982_vm2, %v1981_v23  ;;  %v1980_v45 = vadd.f32 %v2076_v17, %v1969_v43 }
0x10fb   :  { %1985 = vst.msk [vmem:[%s2898_s6 + $0x10] sm:$0xff] %vm1982_vm2, %v1980_v45 }

</bundles_post_ra>
